<compile_context>
chip_gen: v6e
topology: v6e:2x2x1
jax: 0.10.0
libtpu: 0.0.40
codegen_flags: <defaults>
</compile_context>

<pallas_src>
import jax
import jax.numpy as jnp
from jax import lax
from jax.experimental import pallas as pl
from jax.experimental.pallas import tpu as pltpu

# Tile caps shared between weight pre-padding and the kernel so V_pad/H_pad are always
# exact multiples of the chosen tiles (no runtime weight pad, no vocab slice needed).
_TM_MAX = 512    # prefill M tile; decode uses round_up(M, 16)
_TV_MAX = 2048   # lane-dense vocab tile
_TK_MAX = 1024   # reduction (hidden) tile


def _round_up(x, m):
    return ((x + m - 1) // m) * m


def _pad_dim(n, tile_max):
    """Padded extent: 128-aligned if it fits one tile, else a multiple of tile_max."""
    n128 = _round_up(n, 128)
    return n128 if n128 <= tile_max else _round_up(n, tile_max)


# ----------------------------- lm_head weight pre-padding -----------------------------
def pad_lm_head_weight(w_vh, *, tv_max=_TV_MAX, tk_max=_TK_MAX):
    """PyTorch lm_head.weight is [V, H]; store transposed [H_pad, V_pad] in bf16,
    padded ONCE at init so the per-call path never pads or casts the big weight."""
    V, H = w_vh.shape
    H_pad, V_pad = _pad_dim(H, tk_max), _pad_dim(V, tv_max)
    w = w_vh.T.astype(jnp.bfloat16)
    if (H_pad, V_pad) != (H, V):
        w = jnp.pad(w, ((0, H_pad - H), (0, V_pad - V)))
    return w


# ----------------------------- lm_head matmul kernels -----------------------------
def _lm_head_kernel_acc(h_ref, w_ref, o_ref, acc_ref):
    # grid = (M_tiles, V_tiles, K_tiles); reduction axis (K) innermost.
    @pl.when(pl.program_id(2) == 0)
    def _():
        acc_ref[...] = jnp.zeros_like(acc_ref)

    acc_ref[...] += jnp.dot(h_ref[...], w_ref[...], preferred_element_type=jnp.float32)

    @pl.when(pl.program_id(2) == pl.num_programs(2) - 1)
    def _():
        o_ref[...] = acc_ref[...].astype(o_ref.dtype)


def _lm_head_kernel_k1(h_ref, w_ref, o_ref):
    # Single K step: write the MXU result straight to the output tile (no acc round trip).
    o_ref[...] = jnp.dot(
        h_ref[...], w_ref[...], preferred_element_type=jnp.float32
    ).astype(o_ref.dtype)


def lm_head_pallas(hidden_2d, w_padded, *, tm_max=_TM_MAX, tv_max=_TV_MAX,
                   tk_max=_TK_MAX, out_dtype=jnp.float32):
    """hidden_2d [M, H] @ w_padded [H_pad, V_pad] (pre-padded bf16) -> logits [M, V_pad].

    bf16 operands, f32 MXU accumulation.  Returns all V_pad columns (padded columns
    hold 0.0) — callers mask/slice only if they actually need exactly V columns.
    The M axis is sliced back to M only if it had to be padded.
    """
    M, H = hidden_2d.shape
    H_pad, V_pad = w_padded.shape
    assert H <= H_pad

    tm = min(_round_up(M, 16), tm_max)
    tv = V_pad if V_pad <= tv_max else tv_max
    tk = H_pad if H_pad <= tk_max else tk_max
    assert V_pad % tv == 0 and H_pad % tk == 0, "use pad_lm_head_weight with matching tiles"

    M_pad = _round_up(M, tm)
    h = hidden_2d.astype(jnp.bfloat16)
    if (M_pad, H_pad) != (M, H):     # activation pad only: tiny vs the weight stream
        h = jnp.pad(h, ((0, M_pad - M), (0, H_pad - H)))

    grid_m, grid_v, grid_k = M_pad // tm, V_pad // tv, H_pad // tk

    # Double-buffered tile working set + f32 accumulator, with headroom; keeps the
    # larger tiles legal on v5e (16 MiB scoped default) and within v7x's 64 MiB VMEM.
    vmem_bytes = 2 * (tm * tk * 2) + 2 * (tk * tv * 2) + 2 * (tm * tv * 4) + tm * tv * 4
    vmem_limit = min(max(int(vmem_bytes * 1.25) + (4 << 20), 32 << 20), 56 << 20)

    cost = pl.CostEstimate(
        flops=2 * M_pad * H_pad * V_pad,
        bytes_accessed=M_pad * H_pad * 2 + grid_m * H_pad * V_pad * 2 + M_pad * V_pad * 4,
        transcendentals=0,
    )

    if grid_k == 1:
        kernel = _lm_head_kernel_k1
        dims = ("parallel", "parallel")
        grid_spec = pltpu.PrefetchScalarGridSpec(
            num_scalar_prefetch=0,
            grid=(grid_m, grid_v),
            in_specs=[
                pl.BlockSpec((tm, tk), lambda i, j: (i, 0)),
                pl.BlockSpec((tk, tv), lambda i, j: (0, j)),
            ],
            out_specs=pl.BlockSpec((tm, tv), lambda i, j: (i, j)),
        )
    else:
        kernel = _lm_head_kernel_acc
        dims = ("parallel", "parallel", "arbitrary")
        grid_spec = pltpu.PrefetchScalarGridSpec(
            num_scalar_prefetch=0,
            grid=(grid_m, grid_v, grid_k),
            in_specs=[
                pl.BlockSpec((tm, tk), lambda i, j, k: (i, k)),
                pl.BlockSpec((tk, tv), lambda i, j, k: (k, j)),
            ],
            out_specs=pl.BlockSpec((tm, tv), lambda i, j, k: (i, j)),
            scratch_shapes=[pltpu.VMEM((tm, tv), jnp.float32)],
        )

    out = pl.pallas_call(
        kernel,
        out_shape=jax.ShapeDtypeStruct((M_pad, V_pad), out_dtype),
        grid_spec=grid_spec,
        compiler_params=pltpu.CompilerParams(
            dimension_semantics=dims, vmem_limit_bytes=vmem_limit),
        cost_estimate=cost,
    )(h, w_padded)

    if M_pad != M:
        out = out[:M]
    return out


# ----------------------------- last-token argmax kernel -----------------------------
def argmax_last_pallas(last_logits, valid_v, *, block_bytes_max=16 << 20):
    """last_logits [B, V_pad] -> token ids [B, 1] int32.

    Padded vocab columns (index >= valid_v) are masked to -inf inside the kernel, so
    no host-side pad/slice is needed.  Normally runs as a single grid step."""
    B, V_pad = last_logits.shape
    assert valid_v <= V_pad

    tv = V_pad
    while B * tv * 4 > block_bytes_max and tv % 2 == 0 and (tv // 2) % 128 == 0:
        tv //= 2
    grid_j = V_pad // tv

    def kernel(x_ref, o_ref, max_sc, idx_sc):
        j = pl.program_id(0)

        @pl.when(j == 0)
        def _():
            max_sc[...] = jnp.full_like(max_sc, -jnp.inf)
            idx_sc[...] = jnp.zeros_like(idx_sc)

        x = x_ref[...]                                            # [B, tv]
        gidx = lax.broadcasted_iota(jnp.int32, x.shape, 1) + j * tv
        x = jnp.where(gidx < valid_v, x, -jnp.inf)                # mask padded columns
        tile_max = jnp.max(x, axis=-1, keepdims=True)             # [B, 1]
        # first index attaining the tile max (torch.argmax tie-break)
        tile_idx = jnp.min(jnp.where(x == tile_max, gidx, V_pad), axis=-1, keepdims=True)
        better = tile_max > max_sc[...]                           # strict: earlier index wins ties
        idx_sc[...] = jnp.where(better, tile_idx, idx_sc[...])
        max_sc[...] = jnp.where(better, tile_max, max_sc[...])

        @pl.when(j == pl.num_programs(0) - 1)
        def _():
            o_ref[...] = idx_sc[...].astype(jnp.int32)

    return pl.pallas_call(
        kernel,
        out_shape=jax.ShapeDtypeStruct((B, 1), jnp.int32),
        grid_spec=pltpu.PrefetchScalarGridSpec(
            num_scalar_prefetch=0,
            grid=(grid_j,),
            in_specs=[pl.BlockSpec((B, tv), lambda j: (0, j))],
            out_specs=pl.BlockSpec((B, 1), lambda j: (0, 0)),
            scratch_shapes=[
                pltpu.VMEM((B, 1), jnp.float32),
                pltpu.VMEM((B, 1), jnp.int32),
            ],
        ),
        compiler_params=pltpu.CompilerParams(dimension_semantics=("arbitrary",)),
    )(last_logits.astype(jnp.float32))


# ----------------------------- EaModel.forward wrapper -----------------------------
def make_params(key, vocab_size, hidden_size, *, tv_max=_TV_MAX, tk_max=_TK_MAX):
    k0, k1 = jax.random.split(key)
    embed = jax.random.normal(k0, (vocab_size, hidden_size), jnp.float32) * 0.02
    lm_head_w = jax.random.normal(k1, (vocab_size, hidden_size), jnp.float32) * 0.02
    return {
        "embed": embed,
        "lm_head_t": pad_lm_head_weight(lm_head_w, tv_max=tv_max, tk_max=tk_max),
        "vocab_size": vocab_size,
        "hidden_size": hidden_size,
    }


def ea_model_forward(params, input_ids, attention_mask=None, output_orig=True, init=True):
    """Mirrors EaModel.forward(init=True, logits_processor=None, output_orig=True)."""
    # base_model.model stand-in (external sub-module): deterministic embedding lookup.
    hidden_states = params["embed"][input_ids]                     # [B, S, H]
    B, S, H = hidden_states.shape
    V = params["vocab_size"]
    V_pad = params["lm_head_t"].shape[1]

    # orig = base_model.lm_head(hidden_states)  -- Pallas bf16 MXU matmul kernel
    orig_pad = lm_head_pallas(hidden_states.reshape(B * S, H), params["lm_head_t"])
    orig_pad = orig_pad.reshape(B, S, V_pad)                       # [B, S, V_pad] f32

    # token = argmax(orig[:, -1], dim=-1)[:, None]  -- padded columns masked in-kernel
    token = argmax_last_pallas(orig_pad[:, -1, :], V)              # [B, 1] int32

    # input_ids = cat((input_ids, token), dim=1)
    new_input_ids = jnp.concatenate([input_ids, token.astype(input_ids.dtype)], axis=1)

    # Only slice padded vocab columns when V is actually unaligned (no-op otherwise).
    orig = orig_pad if V_pad == V else orig_pad[..., :V]

    # TODO(synk): ea_layer.topK_genrate (EAGLE draft-tree speculative generation) is an
    # external autoregressive sub-module with data-dependent control flow; not translated.
    ea_logits = None

    if output_orig:
        return ea_logits, orig, hidden_states, token, new_input_ids
    return ea_logits, hidden_states, token


if __name__ == "__main__":
    B, S, H, V = 2, 8, 128, 256

    key = jax.random.PRNGKey(0)
    k_ids, k_params, k_misc = jax.random.split(key, 3)

    input_ids = jax.random.randint(k_ids, (B, S), 0, V, dtype=jnp.int32)
    attention_mask = jnp.ones((B, S), dtype=jnp.int32)
    params = make_params(k_params, V, H)

    ea_logits, orig, hidden_states, token, new_input_ids = ea_model_forward(
        params, input_ids, attention_mask, output_orig=True, init=True
    )
    jax.block_until_ready((orig, hidden_states, token, new_input_ids))

    # --- sanity checks against a pure-JAX reference (bf16 inputs, f32 accumulation) ---
    h2d = hidden_states.reshape(B * S, H)
    w_ref = params["lm_head_t"][:H, :V].astype(jnp.float32)
    ref_logits = (h2d.astype(jnp.bfloat16).astype(jnp.float32) @ w_ref).reshape(B, S, V)
    ref_token = jnp.argmax(ref_logits[:, -1, :], axis=-1)[:, None].astype(jnp.int32)

    assert orig.shape == (B, S, V)
    assert token.shape == (B, 1)
    assert new_input_ids.shape == (B, S + 1)
    assert jnp.allclose(orig, ref_logits, atol=1e-3, rtol=1e-3)
    assert jnp.array_equal(token, ref_token)

    # --- non-tile-aligned (odd) shapes: weight pre-padded once, vocab masked in argmax ---
    Hm, Vm, Mm = 100, 300, 6
    km0, km1, km2, km3 = jax.random.split(k_misc, 4)
    h_odd = jax.random.normal(km0, (Mm, Hm), jnp.float32)
    w_odd_vh = jax.random.normal(km1, (Vm, Hm), jnp.float32)
    w_odd_pad = pad_lm_head_weight(w_odd_vh)                      # [128, 384] bf16
    logits_odd_pad = lm_head_pallas(h_odd, w_odd_pad)             # [6, 384]
    tok_odd = argmax_last_pallas(logits_odd_pad, Vm)
    jax.block_until_ready((logits_odd_pad, tok_odd))
    logits_odd = logits_odd_pad[:, :Vm]
    ref_odd = (h_odd.astype(jnp.bfloat16).astype(jnp.float32)
               @ w_odd_pad[:Hm, :Vm].astype(jnp.float32))
    assert logits_odd.shape == (Mm, Vm)
    assert jnp.allclose(logits_odd, ref_odd, atol=1e-3, rtol=1e-3)
    assert jnp.array_equal(
        tok_odd[:, 0], jnp.argmax(logits_odd, axis=-1).astype(jnp.int32)
    )

    # --- multi-K accumulation path + M remainder (small tile overrides) ---
    M3, H3, V3 = 24, 256, 512
    h3 = jax.random.normal(km2, (M3, H3), jnp.float32)
    w3_vh = jax.random.normal(km3, (V3, H3), jnp.float32)
    w3_pad = pad_lm_head_weight(w3_vh, tv_max=256, tk_max=128)    # [256, 512] bf16
    logits3 = lm_head_pallas(h3, w3_pad, tm_max=16, tv_max=256, tk_max=128)
    jax.block_until_ready(logits3)
    ref3 = h3.astype(jnp.bfloat16).astype(jnp.float32) @ w3_pad.astype(jnp.float32)
    assert logits3.shape == (M3, V3)
    assert jnp.allclose(logits3, ref3, atol=1e-3, rtol=1e-3)

    print("KERNEL_OK")
</pallas_src>

<mosaic_0001>
module attributes {stable_mosaic.version = 11 : i64} {
  func.func @_lm_head_kernel_k1(%arg0: i32, %arg1: i32, %arg2: memref<16x128xbf16, #tpu.memory_space<vmem>>, %arg3: memref<128x256xbf16, #tpu.memory_space<vmem>>, %arg4: memref<16x256xf32, #tpu.memory_space<vmem>>) attributes {dimension_semantics = [#tpu.dimension_semantics<parallel>, #tpu.dimension_semantics<parallel>], iteration_bounds = array<i64: 1, 1>, scalar_prefetch = 0 : i64, scratch_operands = 0 : i64, tpu.core_type = #tpu.core_type<tc>, window_params = [{transform_indices = @transform_0, window_bounds = array<i64: 16, 128>}, {transform_indices = @transform_1, window_bounds = array<i64: 128, 256>}, {transform_indices = @transform_2, window_bounds = array<i64: 16, 256>}]} {
    %c0 = arith.constant 0 : index
    %c0_0 = arith.constant 0 : index
    %0 = vector.load %arg2[%c0, %c0_0] : memref<16x128xbf16, #tpu.memory_space<vmem>>, vector<16x128xbf16>
    %c0_1 = arith.constant 0 : index
    %c0_2 = arith.constant 0 : index
    %1 = vector.load %arg3[%c0_1, %c0_2] : memref<128x256xbf16, #tpu.memory_space<vmem>>, vector<128x256xbf16>
    %cst = arith.constant dense<0.000000e+00> : vector<16x256xf32>
    %2 = tpu.matmul %0, %1, %cst {dimension_numbers = #tpu.dot_dimension_numbers<[1], [0], [0], [1], [0, 0, 1, 1], [], []>} : vector<16x128xbf16>, vector<128x256xbf16>, vector<16x256xf32> -> vector<16x256xf32>
    %c0_3 = arith.constant 0 : index
    %c0_4 = arith.constant 0 : index
    %3 = vector.load %arg4[%c0_3, %c0_4] : memref<16x256xf32, #tpu.memory_space<vmem>>, vector<16x256xf32>
    tpu.vector_store %arg4[%c0_3, %c0_4], %2 {strides = array<i32>} : memref<16x256xf32, #tpu.memory_space<vmem>>, vector<16x256xf32>,
    return
  }
  func.func @transform_0(%arg0: i32, %arg1: i32) -> (i32, i32) {
    %c0_i32 = arith.constant 0 : i32
    %c0_i32_0 = arith.constant 0 : i32
    return %arg0, %c0_i32 : i32, i32
  }
  func.func @transform_1(%arg0: i32, %arg1: i32) -> (i32, i32) {
    %c0_i32 = arith.constant 0 : i32
    %c0_i32_0 = arith.constant 0 : i32
    return %c0_i32, %arg1 : i32, i32
  }
  func.func @transform_2(%arg0: i32, %arg1: i32) -> (i32, i32) {
    %c0_i32 = arith.constant 0 : i32
    return %arg0, %arg1 : i32, i32
  }
}

</mosaic_0001>

<bundles_post_ra>
// kernel: tpu_custom_call.1
= control target key start
LH: loop header
LB: loop body
LE: loop exit
PB: predicated region body
PF: predicated region fallthrough
CT: control target
= control target key end

     0   :  { %7 = vsyncpa [#allocation3], 0  ;;  %s362_s0 = inlined_call_operand.hbm [shape: bf16[16,128], index: 0, kind: input, shape index: {}]   ;;  %s363_s1 = inlined_call_operand.hbm [shape: bf16[128,256], index: 1, kind: input, shape index: {}]   ;;  %s364_s2 = inlined_call_operand.hbm [shape: f32[16,256], index: 2, kind: output, shape index: {}]  }
   0x1   :  { %8 = vsyncpa [#allocation6], 0 }
   0x2   :  { %9 = vsyncpa [#allocation4], 0  ;;  %s328_s9 = smov [#allocation2]  }
   0x3   :  { %s15_s10 = sshll.u32 %s328_s9, 4  ;;  %s16_s10 = int_to_ptr.vmem [resolvable:$true] %s15_s10 }
   0x4   :  { %s270_s11 = scalar_lea.vmem %s16_s10, 128  ;;  %p275_p1 = scmp.lt.s32.totalorder %s16_s10, %s16_s10 }
   0x5   :  { %p271_p0 = scmp.ne.s32.totalorder %s16_s10, %s270_s11  ;;  %p276_p2 = scmp.lt.s32.totalorder %s270_s11, %s270_s11 }
   0x7   :  { %p277_p3 = por %p276_p2, %p275_p1 }
   0x9   :  { %p278_p4 = pnand %p277_p3, %p271_p0 }
   0xb   :  { %281 = shalt.err (!%p278_p4)
}
   0xc   :  { %s329_s12 = smov 64   ;;  %s330_s13 = smov 4  }
   0xd   :  { %21 = dma.hbm_to_vmem [thread:$0]  %s362_s0, 128, %s16_s10, [#allocation3], %s329_s12, %s329_s12, %s330_s13  }
   0xe   :  { %s331_s16 = smov [#allocation5]  }
   0xf   :  { %s27_s17 = sshll.u32 %s331_s16, 4  ;;  %s28_s17 = int_to_ptr.vmem [resolvable:$true] %s27_s17 }
  0x10   :  { %s290_s18 = scalar_lea.vmem %s28_s17, 2048  ;;  %p295_p6 = scmp.lt.s32.totalorder %s28_s17, %s28_s17 }
  0x11   :  { %p291_p5 = scmp.ne.s32.totalorder %s28_s17, %s290_s18  ;;  %p296_p7 = scmp.lt.s32.totalorder %s290_s18, %s290_s18 }
  0x13   :  { %p297_p8 = por %p296_p7, %p295_p6 }
  0x15   :  { %p298_p9 = pnand %p297_p8, %p291_p5 }
  0x17   :  { %301 = shalt.err (!%p298_p9)
}
  0x18   :  { %s332_s19 = smov 128   ;;  %s333_s20 = smov 8  }
  0x19   :  { %33 = dma.hbm_to_vmem [thread:$0]  %s363_s1, 2048, %s28_s17, [#allocation6], %s332_s19, %s332_s19, %s333_s20  }
  0x1a   :  { %322 = dma.done.wait [#allocation3], 128  }
  0x1b   :  { %323 = vsyncadd [#allocation3], 4294967168 }
  0x1c   :  { %324 = dma.done.wait [#allocation6], 2048  }
  0x1d   :  { %325 = vsyncadd [#allocation6], 4294965248  ;;  %v334_v0 = vmov 0   ;;  %v237_v1 = vld [vmem:[#allocation5 + $0x74] ss:$8 sps:$4 sm:$0xff]   ;;  %s335_s0 = smov [#allocation7]  }
  0x1e   :  { %177 = vmatprep.mubr.bf16.mxu0 %v334_v0  ;;  %v239_v2 = vld [vmem:[#allocation5 + $0x70] ss:$8 sps:$4 sm:$0xff]   ;;  %145 = vmatprep.subr.bf16.mxu0 %v237_v1  ;;  %v240_v3 = vld [vmem:[#allocation5 + $0x64] ss:$8 sps:$4 sm:$0xff]   ;;  %v242_v4 = vld [vmem:[#allocation5 + $0x60] ss:$8 sps:$4 sm:$0xff]  }
  0x1f   :  { %146 = vmatpush1.bf16.msra.mxu0 %v239_v2  ;;  %v243_v5 = vld [vmem:[#allocation5 + $0x54] ss:$8 sps:$4 sm:$0xff]   ;;  %v245_v6 = vld [vmem:[#allocation5 + $0x50] ss:$8 sps:$4 sm:$0xff]   ;;  %v246_v7 = vld [vmem:[#allocation5 + $0x44] ss:$8 sps:$4 sm:$0xff]  }
  0x20   :  { %147 = vmatprep.subr.bf16.mxu0 %v240_v3  ;;  %v248_v8 = vld [vmem:[#allocation5 + $0x40] ss:$8 sps:$4 sm:$0xff]   ;;  %v249_v9 = vld [vmem:[#allocation5 + $0x34] ss:$8 sps:$4 sm:$0xff]   ;;  %v251_v10 = vld [vmem:[#allocation5 + $0x30] ss:$8 sps:$4 sm:$0xff]  }
  0x21   :  { %v252_v11 = vld [vmem:[#allocation5 + $0x24] ss:$8 sps:$4 sm:$0xff]   ;;  %v254_v12 = vld [vmem:[#allocation5 + $0x20] ss:$8 sps:$4 sm:$0xff]   ;;  %v255_v13 = vld [vmem:[#allocation5 + $0x14] ss:$8 sps:$4 sm:$0xff]  }
  0x22   :  { %v257_v14 = vld [vmem:[#allocation5 + $0x10] ss:$8 sps:$4 sm:$0xff]   ;;  %v258_v15 = vld [vmem:[#allocation5 + $0x4] ss:$8 sps:$4 sm:$0xff]   ;;  %v260_v16 = vld [vmem:[#allocation5] ss:$8 sps:$4 sm:$0xff]  }
  0x23   :  { %148 = vmatpush1.bf16.msra.mxu0 %v242_v4  ;;  %v261_v17 = vld [vmem:[#allocation2] sm:$0xff]   ;;  %s197_s1 = sshll.u32 %s335_s0, 4  ;;  %s198_s1 = int_to_ptr.vmem [resolvable:$true] %s197_s1 }
  0x24   :  { %149 = vmatprep.subr.bf16.mxu0 %v243_v5  ;;  %s302_s23 = scalar_lea.vmem %s198_s1, 512  ;;  %p307_p11 = scmp.lt.s32.totalorder %s198_s1, %s198_s1 }
  0x25   :  { %p303_p10 = scmp.ne.s32.totalorder %s198_s1, %s302_s23  ;;  %p308_p12 = scmp.lt.s32.totalorder %s302_s23, %s302_s23 }
  0x27   :  { %150 = vmatpush1.bf16.msra.mxu0 %v245_v6  ;;  %p309_p13 = por %p308_p12, %p307_p11 }
  0x28   :  { %151 = vmatprep.subr.bf16.mxu0 %v246_v7 }
  0x29   :  { %p310_p0 = pnand %p309_p13, %p303_p10 }
  0x2b   :  { %152 = vmatpush1.bf16.msra.mxu0 %v248_v8 }
  0x2c   :  { %153 = vmatprep.subr.bf16.mxu0 %v249_v9 }
  0x2f   :  { %154 = vmatpush1.bf16.msra.mxu0 %v251_v10 }
  0x30   :  { %155 = vmatprep.subr.bf16.mxu0 %v252_v11 }
  0x33   :  { %156 = vmatpush1.bf16.msra.mxu0 %v254_v12 }
  0x34   :  { %157 = vmatprep.subr.bf16.mxu0 %v255_v13 }
  0x37   :  { %158 = vmatpush1.bf16.msra.mxu0 %v257_v14 }
  0x38   :  { %159 = vmatprep.subr.bf16.mxu0 %v258_v15 }
  0x3b   :  { %160 = vmatpush1.bf16.msra.mxu0 %v260_v16 }
  0x3e   :  { %178 = vmatmul.mubr.bf16.vlgmr.msra.gmra.mxu0 %v261_v17 }
  0xfe   :  { %v179_v18 = vpop.f32.mrf.mxu0 }
  0xff   :  { %188 = vst [vmem:[#allocation7] sm:$0xff] %v179_v18 }
 0x100   :  { %v181_v19 = vpop.f32.mrf.mxu0 }
 0x101   :  { %189 = vst [vmem:[#allocation7 + $0x8] sm:$0xff] %v181_v19 }
 0x102   :  { %v183_v20 = vpop.f32.mrf.mxu0 }
 0x103   :  { %190 = vst [vmem:[#allocation7 + $0x10] sm:$0xff] %v183_v20 }
 0x104   :  { %v185_v21 = vpop.f32.mrf.mxu0 }
 0x105   :  { %191 = vst [vmem:[#allocation7 + $0x18] sm:$0xff] %v185_v21 }
 0x106   :  { %313 = shalt.err (!%p310_p0)
}
 0x107   :  { %s336_s24 = smov 256   ;;  %s337_s25 = smov 16  }
 0x108   :  { %203 = dma.vmem_to_hbm [thread:$0]  %s198_s1, 512, %s364_s2, [#allocation4], %s336_s24, %s336_s24, %s337_s25  }
 0x109   :  { %326 = dma.done.wait [#allocation4], 512  }
 0x10a   :  { %327 = vsyncadd [#allocation4], 4294966784 }
 0x10b   :  { %207 = vsyncpa [#allocation3], 1 }
 0x10c   :  { %208 = vsyncpa [#allocation6], 1 }
 0x10d   :  { %209 = vsyncpa [#allocation4], 1 }

</bundles_post_ra>
